<compile_context>
chip_gen: v7x
topology: tpu7x:2x2x1
jax: 0.10.0
libtpu: 0.0.40
codegen_flags: <defaults>
</compile_context>

<pallas_src>
import functools
import math

import jax
import jax.numpy as jnp
from jax.experimental import pallas as pl
from jax.experimental.pallas import tpu as pltpu


# ---------------------------------------------------------------------------
# Pallas kernel: fused 3x3 conv (padding=1) + bias + ReLU for one image.
#   x_ref    : [1, Cin, Lp]   bf16  zero-padded image, spatial flattened (row stride Wp)
#   w_ref    : [Cout, 9*Cin]  bf16  taps folded into the contraction dim
#   b_ref    : [Cout, 1]      f32
#   o_ref    : [1, Cout, M]   f32   M = H*Wp (multiple of 128 -> unmasked lane-dense stores)
#   xcol_ref : [9*Cin, M]     bf16  VMEM scratch: stacked shifted views ("in-VMEM im2col")
# ---------------------------------------------------------------------------
def _conv3x3_relu_kernel(x_ref, w_ref, b_ref, o_ref, xcol_ref, *, wp: int):
    cin = x_ref.shape[1]
    m = o_ref.shape[2]
    xc = x_ref[0]  # [Cin, Lp] bf16 -- single full-tile load, sliced in-register below

    # Build the [9*Cin, M] operand once per image; the unaligned lane shifts
    # (off = dy*Wp + dx) are paid here, outside the matmul path.
    for dy in range(3):
        for dx in range(3):
            t = dy * 3 + dx
            off = dy * wp + dx                       # static flat shift for this tap
            xcol_ref[t * cin:(t + 1) * cin, :] = xc[:, off:off + m]

    # Single MXU contraction over K = 9*Cin: ~9x fewer vmatmul pushes / result pops
    # than the per-tap form, and no [Cout, M] f32 accumulator adds on the VPU.
    acc = jnp.dot(w_ref[...], xcol_ref[...], preferred_element_type=jnp.float32)

    # f32 epilogue: bias + ReLU, lane-dense store of the [Cout, M] slab.
    o_ref[0] = jnp.maximum(acc + b_ref[...], 0.0).astype(o_ref.dtype)


# ---------------------------------------------------------------------------
# Wrapper: NCHW in, NCHW out (PyTorch Conv2d(3, padding=1) + ReLU semantics).
# ---------------------------------------------------------------------------
@jax.jit
def conv3x3_relu(x, w, b):
    """x: [B, Cin, H, W] f32; w: [Cout, Cin, 3, 3] f32; b: [Cout] f32 -> [B, Cout, H, W] f32."""
    B, Cin, H, W = x.shape
    Cout = w.shape[0]

    # Padded row stride Wp >= W+2 chosen so M = H*Wp is a multiple of 128:
    # unmasked full-width output stores + clean lane tiling of the tap slices.
    g = 128 // math.gcd(H, 128)
    Wp = pl.cdiv(W + 2, g) * g                 # W=16, H=16 -> Wp=24
    M = H * Wp                                 # per-image output columns (incl. junk cols)
    Lp = pl.cdiv((H + 3) * Wp, 128) * 128      # flat padded input length, lane-aligned

    # Zero-pad spatially (1 top / 2 bottom rows, 1 left / Wp-W-1 right cols), flatten
    # spatial, pad flat axis to Lp, cast to bf16 MXU operand dtype.
    # TODO(synk): for bandwidth-bound production shapes, move padding/halo handling into the
    # kernel (DMA unpadded rows + zero the halo in VMEM) to avoid this extra HBM pass.
    xp = jnp.pad(x, ((0, 0), (0, 0), (1, 2), (1, Wp - W - 1)))
    x_flat = xp.reshape(B, Cin, (H + 3) * Wp)
    x_flat = jnp.pad(x_flat, ((0, 0), (0, 0), (0, Lp - (H + 3) * Wp))).astype(jnp.bfloat16)

    # Weights folded to [Cout, 9*Cin]: column (dy*3+dx)*Cin + ci  <->  w[:, ci, dy, dx]
    # (matches the stacking order of the scratch in the kernel).
    w2 = w.transpose(0, 2, 3, 1).reshape(Cout, 9 * Cin).astype(jnp.bfloat16)
    b2 = b.reshape(Cout, 1).astype(jnp.float32)

    kernel = functools.partial(_conv3x3_relu_kernel, wp=Wp)
    out_flat = pl.pallas_call(
        kernel,
        out_shape=jax.ShapeDtypeStruct((B, Cout, M), jnp.float32),
        grid_spec=pltpu.PrefetchScalarGridSpec(
            num_scalar_prefetch=0,
            grid=(B,),     # one image per step; >= 2 parallel steps so both v7x TCs get work
            in_specs=[
                pl.BlockSpec((1, Cin, Lp), lambda i: (i, 0, 0)),
                pl.BlockSpec((Cout, 9 * Cin), lambda i: (0, 0)),
                pl.BlockSpec((Cout, 1), lambda i: (0, 0)),
            ],
            out_specs=pl.BlockSpec((1, Cout, M), lambda i: (i, 0, 0)),
            scratch_shapes=[pltpu.VMEM((9 * Cin, M), jnp.bfloat16)],
        ),
        compiler_params=pltpu.CompilerParams(
            dimension_semantics=("parallel",),
            # Explicit budget: double-buffered in/out blocks + scratch are tiny at these
            # shapes; 32 MiB is safe on v5e/v6e (128 MiB VMEM) and on v7x (64 MiB VMEM).
            vmem_limit_bytes=32 * 1024 * 1024,
        ),
    )(x_flat, w2, b2)

    # Free reshape back to NCHW + drop the Wp-W junk columns per row. No transposes.
    return out_flat.reshape(B, Cout, H, Wp)[:, :, :, :W]


# ---------------------------------------------------------------------------
# Pure-JAX reference (f32) for sanity checking.
# ---------------------------------------------------------------------------
def conv3x3_relu_ref(x, w, b):
    dn = ("NCHW", "OIHW", "NCHW")
    y = jax.lax.conv_general_dilated(x, w, (1, 1), "SAME", dimension_numbers=dn)
    return jnp.maximum(y + b[None, :, None, None], 0.0)


if __name__ == "__main__":
    B, Cin, Cout, H, W = 2, 4, 8, 16, 16
    key = jax.random.PRNGKey(0)
    k1, k2, k3 = jax.random.split(key, 3)

    x = jax.random.normal(k1, (B, Cin, H, W), dtype=jnp.float32)
    w = jax.random.normal(k2, (Cout, Cin, 3, 3), dtype=jnp.float32) * 0.1
    b = jax.random.normal(k3, (Cout,), dtype=jnp.float32) * 0.1

    out = jax.block_until_ready(conv3x3_relu(x, w, b))
    ref = jax.block_until_ready(conv3x3_relu_ref(x, w, b))

    assert out.shape == (B, Cout, H, W), out.shape
    # bf16 MXU operands with f32 accumulation -> loosened tolerance vs f32 reference.
    max_err = float(jnp.max(jnp.abs(out - ref)))
    assert max_err < 2e-2, f"max abs err {max_err}"
    print("KERNEL_OK")
</pallas_src>

<mosaic_0001>
module attributes {stable_mosaic.version = 11 : i64} {
  func.func @_conv3x3_relu_kernel(%arg0: i32, %arg1: memref<1x4x512xbf16, #tpu.memory_space<vmem>>, %arg2: memref<8x36xbf16, #tpu.memory_space<vmem>>, %arg3: memref<8x1xf32, #tpu.memory_space<vmem>>, %arg4: memref<1x8x384xf32, #tpu.memory_space<vmem>>, %arg5: memref<36x384xbf16, #tpu.memory_space<vmem>>) attributes {dimension_semantics = [#tpu.dimension_semantics<parallel>], iteration_bounds = array<i64: 2>, scalar_prefetch = 0 : i64, scratch_operands = 1 : i64, tpu.core_type = #tpu.core_type<tc>, window_params = [{transform_indices = @transform_0, window_bounds = array<i64: 1, 4, 512>}, {pipeline_mode = #tpu.pipeline_mode<synchronous>, transform_indices = @transform_1, window_bounds = array<i64: 8, 36>}, {pipeline_mode = #tpu.pipeline_mode<synchronous>, transform_indices = @transform_2, window_bounds = array<i64: 8, 1>}, {transform_indices = @transform_3, window_bounds = array<i64: 1, 8, 384>}]} {
    %c0 = arith.constant 0 : index
    %c0_0 = arith.constant 0 : index
    %c0_1 = arith.constant 0 : index
    %0 = vector.load %arg1[%c0, %c0_0, %c0_1] : memref<1x4x512xbf16, #tpu.memory_space<vmem>>, vector<1x4x512xbf16>
    %1 = vector.shape_cast %0 : vector<1x4x512xbf16> to vector<4x512xbf16>
    %2 = vector.extract_strided_slice %1 {offsets = [0, 0], sizes = [4, 384], strides = [1, 1]} : vector<4x512xbf16> to vector<4x384xbf16>
    %c0_2 = arith.constant 0 : index
    %c0_3 = arith.constant 0 : index
    %3 = vector.load %arg5[%c0_2, %c0_3] : memref<36x384xbf16, #tpu.memory_space<vmem>>, vector<4x384xbf16>
    tpu.vector_store %arg5[%c0_2, %c0_3], %2 {strides = array<i32>} : memref<36x384xbf16, #tpu.memory_space<vmem>>, vector<4x384xbf16>,
    %4 = vector.extract_strided_slice %1 {offsets = [0, 1], sizes = [4, 384], strides = [1, 1]} : vector<4x512xbf16> to vector<4x384xbf16>
    %c4 = arith.constant 4 : index
    %c0_4 = arith.constant 0 : index
    %5 = vector.load %arg5[%c4, %c0_4] : memref<36x384xbf16, #tpu.memory_space<vmem>>, vector<4x384xbf16>
    tpu.vector_store %arg5[%c4, %c0_4], %4 {strides = array<i32>} : memref<36x384xbf16, #tpu.memory_space<vmem>>, vector<4x384xbf16>,
    %6 = vector.extract_strided_slice %1 {offsets = [0, 2], sizes = [4, 384], strides = [1, 1]} : vector<4x512xbf16> to vector<4x384xbf16>
    %c8 = arith.constant 8 : index
    %c0_5 = arith.constant 0 : index
    %7 = vector.load %arg5[%c8, %c0_5] : memref<36x384xbf16, #tpu.memory_space<vmem>>, vector<4x384xbf16>
    tpu.vector_store %arg5[%c8, %c0_5], %6 {strides = array<i32>} : memref<36x384xbf16, #tpu.memory_space<vmem>>, vector<4x384xbf16>,
    %8 = vector.extract_strided_slice %1 {offsets = [0, 24], sizes = [4, 384], strides = [1, 1]} : vector<4x512xbf16> to vector<4x384xbf16>
    %c12 = arith.constant 12 : index
    %c0_6 = arith.constant 0 : index
    %9 = vector.load %arg5[%c12, %c0_6] : memref<36x384xbf16, #tpu.memory_space<vmem>>, vector<4x384xbf16>
    tpu.vector_store %arg5[%c12, %c0_6], %8 {strides = array<i32>} : memref<36x384xbf16, #tpu.memory_space<vmem>>, vector<4x384xbf16>,
    %10 = vector.extract_strided_slice %1 {offsets = [0, 25], sizes = [4, 384], strides = [1, 1]} : vector<4x512xbf16> to vector<4x384xbf16>
    %c16 = arith.constant 16 : index
    %c0_7 = arith.constant 0 : index
    %11 = vector.load %arg5[%c16, %c0_7] : memref<36x384xbf16, #tpu.memory_space<vmem>>, vector<4x384xbf16>
    tpu.vector_store %arg5[%c16, %c0_7], %10 {strides = array<i32>} : memref<36x384xbf16, #tpu.memory_space<vmem>>, vector<4x384xbf16>,
    %12 = vector.extract_strided_slice %1 {offsets = [0, 26], sizes = [4, 384], strides = [1, 1]} : vector<4x512xbf16> to vector<4x384xbf16>
    %c20 = arith.constant 20 : index
    %c0_8 = arith.constant 0 : index
    %13 = vector.load %arg5[%c20, %c0_8] : memref<36x384xbf16, #tpu.memory_space<vmem>>, vector<4x384xbf16>
    tpu.vector_store %arg5[%c20, %c0_8], %12 {strides = array<i32>} : memref<36x384xbf16, #tpu.memory_space<vmem>>, vector<4x384xbf16>,
    %14 = vector.extract_strided_slice %1 {offsets = [0, 48], sizes = [4, 384], strides = [1, 1]} : vector<4x512xbf16> to vector<4x384xbf16>
    %c24 = arith.constant 24 : index
    %c0_9 = arith.constant 0 : index
    %15 = vector.load %arg5[%c24, %c0_9] : memref<36x384xbf16, #tpu.memory_space<vmem>>, vector<4x384xbf16>
    tpu.vector_store %arg5[%c24, %c0_9], %14 {strides = array<i32>} : memref<36x384xbf16, #tpu.memory_space<vmem>>, vector<4x384xbf16>,
    %16 = vector.extract_strided_slice %1 {offsets = [0, 49], sizes = [4, 384], strides = [1, 1]} : vector<4x512xbf16> to vector<4x384xbf16>
    %c28 = arith.constant 28 : index
    %c0_10 = arith.constant 0 : index
    %17 = vector.load %arg5[%c28, %c0_10] : memref<36x384xbf16, #tpu.memory_space<vmem>>, vector<4x384xbf16>
    tpu.vector_store %arg5[%c28, %c0_10], %16 {strides = array<i32>} : memref<36x384xbf16, #tpu.memory_space<vmem>>, vector<4x384xbf16>,
    %18 = vector.extract_strided_slice %1 {offsets = [0, 50], sizes = [4, 384], strides = [1, 1]} : vector<4x512xbf16> to vector<4x384xbf16>
    %c32 = arith.constant 32 : index
    %c0_11 = arith.constant 0 : index
    %19 = vector.load %arg5[%c32, %c0_11] : memref<36x384xbf16, #tpu.memory_space<vmem>>, vector<4x384xbf16>
    tpu.vector_store %arg5[%c32, %c0_11], %18 {strides = array<i32>} : memref<36x384xbf16, #tpu.memory_space<vmem>>, vector<4x384xbf16>,
    %c0_12 = arith.constant 0 : index
    %c0_13 = arith.constant 0 : index
    %20 = vector.load %arg2[%c0_12, %c0_13] : memref<8x36xbf16, #tpu.memory_space<vmem>>, vector<8x36xbf16>
    %c0_14 = arith.constant 0 : index
    %c0_15 = arith.constant 0 : index
    %21 = vector.load %arg5[%c0_14, %c0_15] : memref<36x384xbf16, #tpu.memory_space<vmem>>, vector<36x384xbf16>
    %cst = arith.constant dense<0.000000e+00> : vector<8x384xf32>
    %22 = tpu.matmul %20, %21, %cst {dimension_numbers = #tpu.dot_dimension_numbers<[1], [0], [0], [1], [0, 0, 1, 1], [], []>} : vector<8x36xbf16>, vector<36x384xbf16>, vector<8x384xf32> -> vector<8x384xf32>
    %c0_16 = arith.constant 0 : index
    %c0_17 = arith.constant 0 : index
    %23 = vector.load %arg3[%c0_16, %c0_17] : memref<8x1xf32, #tpu.memory_space<vmem>>, vector<8x1xf32>
    %24 = vector.broadcast %23 : vector<8x1xf32> to vector<8x384xf32>
    %25 = arith.addf %22, %24 : vector<8x384xf32>
    %cst_18 = arith.constant 0.000000e+00 : f32
    %26 = vector.broadcast %cst_18 : f32 to vector<8x384xf32>
    %27 = arith.maximumf %25, %26 : vector<8x384xf32>
    %c0_19 = arith.constant 0 : index
    %c0_20 = arith.constant 0 : index
    %c0_21 = arith.constant 0 : index
    %28 = vector.load %arg4[%c0_19, %c0_20, %c0_21] : memref<1x8x384xf32, #tpu.memory_space<vmem>>, vector<1x8x384xf32>
    %29 = vector.shape_cast %28 : vector<1x8x384xf32> to vector<8x384xf32>
    %30 = vector.shape_cast %27 : vector<8x384xf32> to vector<1x8x384xf32>
    tpu.vector_store %arg4[%c0_19, %c0_20, %c0_21], %30 {strides = array<i32>} : memref<1x8x384xf32, #tpu.memory_space<vmem>>, vector<1x8x384xf32>,
    return
  }
  func.func @transform_0(%arg0: i32) -> (i32, i32, i32) {
    %c0_i32 = arith.constant 0 : i32
    %c0_i32_0 = arith.constant 0 : i32
    %c0_i32_1 = arith.constant 0 : i32
    return %arg0, %c0_i32, %c0_i32_0 : i32, i32, i32
  }
  func.func @transform_1(%arg0: i32) -> (i32, i32) {
    %c0_i32 = arith.constant 0 : i32
    %c0_i32_0 = arith.constant 0 : i32
    %c0_i32_1 = arith.constant 0 : i32
    return %c0_i32, %c0_i32_0 : i32, i32
  }
  func.func @transform_2(%arg0: i32) -> (i32, i32) {
    %c0_i32 = arith.constant 0 : i32
    %c0_i32_0 = arith.constant 0 : i32
    %c0_i32_1 = arith.constant 0 : i32
    return %c0_i32, %c0_i32_0 : i32, i32
  }
  func.func @transform_3(%arg0: i32) -> (i32, i32, i32) {
    %c0_i32 = arith.constant 0 : i32
    %c0_i32_0 = arith.constant 0 : i32
    %c0_i32_1 = arith.constant 0 : i32
    return %arg0, %c0_i32, %c0_i32_0 : i32, i32, i32
  }
}

</mosaic_0001>

<bundles_post_ra>
// kernel: conv3x3_relu.1
= control target key start
LH: loop header
LB: loop body
LE: loop exit
PB: predicated region body
PF: predicated region fallthrough
CT: control target
= control target key end

     0   :  { %s639_s12 = smov 0   ;;  %s680_s0 = inlined_call_operand.vmem [shape: bf16[2,4,512], index: 0, kind: input, shape index: {}]   ;;  %s681_s1 = inlined_call_operand.vmem [shape: bf16[8,36], index: 1, kind: input, shape index: {}]   ;;  %s682_s2 = inlined_call_operand.vmem [shape: f32[8,1], index: 2, kind: input, shape index: {}]   ;;  %s683_s3 = inlined_call_operand.vmem [shape: f32[2,8,384], index: 3, kind: output, shape index: {}]  }
   0x1 LB: > { %s527_s13 = sadd.s32 4294967295, %s605_s12   ;;  %p531_p0 = scmp.ge.s32.totalorder %s605_s12, 1  ;;  %s605_s12 = sphi %s639_s12, %s13_s12  }
   0x2   : > { %p137_p1 = scmp.lt.s32.totalorder %s605_s12, 3 }
   0x4   : > { %p138_p2 = pnand %p531_p0, %p137_p1 }
   0x5   : > { %p161_p3 = scmp.lt.s32.totalorder (!%p138_p2), %s527_s13, 1  ;;  %v178_v0 = vlaneseq (!%p138_p2)  ;;  %v607_v1 = vmov (!%p138_p2), 1983009808   ;;  %s608_s18 = smov (!%p138_p2), 126   ;;  %v611_v12 = vmov (!%p138_p2), 0.0   ;;  %vm617_vm0 = vmmov (!%p138_p2), 0  }
   0x6   : > { %141 = sbr.rel (%p138_p2) target bundleno = 398 (0x18e), region = 32  ;;  %v176_v2 = vunpack.c.l.s4 (!%p138_p2), %v607_v1  ;;  %s609_s19 = smov (!%p138_p2), 127   ;;  %556 = vmatprep.subr.bf16.mxu1 (!%p138_p2), %v611_v12  ;;  %562 = vmatprep.mubr.msk.bf16.mxu1 (!%p138_p2), %vm617_vm0, %v611_v12  ;;  %v618_v13 = vmov (!%p138_p2), 0   ;;  %v325_v14 = vld [vmem:[%s682_s2] sm:$0xff] (!%p138_p2)  ;;  %vm209_vm1 = vcmask (!%p138_p2), 1039360   ;;  %vm237_vm2 = vcmask (!%p138_p2), 850944  }
   0x7   : > { %v179_v3 = vshrl.u32 (!%p138_p2), %v178_v0, 7  ;;  %s610_s20 = smov (!%p138_p2), 104   ;;  %s612_s21 = smov (!%p138_p2), 103   ;;  %417 = vmatprep.mubr.bf16.mxu0 (!%p138_p2), %v618_v13  ;;  %587 = vset.pattern.permute.xlu0 (!%p138_p2), %v618_v13  ;;  %vm207_vm3 = vcmask (!%p138_p2), 1043456   ;;  %vm223_vm4 = vcmask (!%p138_p2), 1031168   ;;  %vm251_vm5 = vcmask (!%p138_p2), 842752  }
   0x8   : > { %v177_v4 = vunpack.c.0.s8 (!%p138_p2), %v176_v2  ;;  %s613_s22 = smov (!%p138_p2), 102   ;;  %s614_s23 = smov (!%p138_p2), 80   ;;  %vm265_vm6 = vcmask (!%p138_p2), 834560   ;;  %vm279_vm7 = vcmask (!%p138_p2), 654336   ;;  %vm293_vm8 = vcmask (!%p138_p2), 646144  }
   0x9   : > { %s615_s24 = smov (!%p138_p2), 79   ;;  %s616_s25 = smov (!%p138_p2), 78   ;;  %vm307_vm9 = vcmask (!%p138_p2), 637952   ;;  %vm375_vm10 = vcmask (!%p138_p2), 1041408   ;;  %vm371_vm11 = vcmask (!%p138_p2), 293888  }
   0xa   : > { %v180_v5 = vsub.s32 (!%p138_p2), %v177_v4, %v179_v3 }
   0xd   : > { %s685_s13 = smov (!%p161_p3, %s527_s13), 1 }
   0xe   : > { %s551_s14 = sshll.u32 %s685_s13, 3  ;;  %s566_s30 = smul.u32 24, %s685_s13 }
   0xf   : > { %s165_s17 = scalar_lea.vmem %s680_s0, %s551_s14 }
  0x10   : > { %v172_v6 = vld [vmem:[%s165_s17] sm:$0xff]  ;;  %s170_s6 = scalar_lea.vmem %s683_s3, %s566_s30 }
  0x11   : > { %v181_v7 = vrot.slane %v172_v6, %v180_v5  ;;  %535 = vst.sshfl [vmem:[#allocation2] sm:$0xf pattern:$0x76325410] %v172_v6  ;;  %v193_v8 = vcombine.low %v172_v6, %v172_v6  ;;  %v174_v9 = vcombine.high %v172_v6, %v172_v6 }
  0x13   : > { %216 = vrot.lane.b32.xlu1 %v181_v7, %s608_s18  ;;  %203 = vrot.lane.b32.xlu0 %v181_v7, %s609_s19  ;;  %v200_v10 = vrot.slane %v193_v8, %v180_v5  ;;  %536 = vst.sshfl [vmem:[#allocation2 + $0x8] sm:$0x3 pattern:$0x76325410] %v174_v9  ;;  %v188_v11 = vrot.slane %v174_v9, %v180_v5 }
  0x17   : > { %232 = vrot.lane.b32.xlu1 %v181_v7, %s610_s20  ;;  %201 = vrot.lane.b32.xlu0 %v200_v10, %s609_s19 }
  0x1b   : > { %230 = vrot.lane.b32.xlu0 %v200_v10, %s610_s20  ;;  %218 = vrot.lane.b32.xlu1 %v188_v11, %s608_s18 }
  0x1f   : > { %244 = vrot.lane.b32.xlu0 %v181_v7, %s612_s21  ;;  %246 = vrot.lane.b32.xlu1 %v188_v11, %s612_s21 }
  0x23   : > { %258 = vrot.lane.b32.xlu0 %v200_v10, %s613_s22  ;;  %260 = vrot.lane.b32.xlu1 %v181_v7, %s613_s22 }
  0x27   : > { %272 = vrot.lane.b32.xlu0 %v181_v7, %s614_s23  ;;  %274 = vrot.lane.b32.xlu1 %v188_v11, %s614_s23 }
  0x2b   : > { %286 = vrot.lane.b32.xlu0 %v200_v10, %s615_s24  ;;  %288 = vrot.lane.b32.xlu1 %v181_v7, %s615_s24 }
  0x2f   : > { %300 = vrot.lane.b32.xlu0 %v181_v7, %s616_s25  ;;  %302 = vrot.lane.b32.xlu1 %v188_v11, %s616_s25 }
  0x33   : > { %328 = vperm.xlu0 %587, %v325_v14  }
  0x85   : > { %v217_v15 = vpop.permute.xlu1 %216  ;;  %v204_v16 = vpop.permute.xlu0 %203 }
  0x86   : > { %v206_v17 = vrot.slane %v204_v16, 4  ;;  %v220_v28 = vrot.slane %v217_v15, 4 }
  0x88   : > { %v211_v18 = vsel %vm209_vm1, %v204_v16, %v206_v17 }
  0x89   : > { %215 = vst [vmem:[#allocation2 + $0x8] sm:$0xc] %v211_v18  ;;  %v233_v19 = vpop.permute.xlu1 %232  ;;  %v202_v20 = vpop.permute.xlu0 %201 }
  0x8a   : > { %v235_v21 = vrot.slane %v233_v19, 4  ;;  %v205_v22 = vrot.slane %v202_v20, 4 }
  0x8c   : > { %v239_v23 = vsel %vm237_vm2, %v233_v19, %v235_v21  ;;  %v208_v24 = vsel %vm207_vm3, %v205_v22, %v206_v17  ;;  %v314_v19 = vld [vmem:[%s681_s1] sm:$0xf] }
  0x8d   : > { %243 = vst [vmem:[#allocation2 + $0x14] sm:$0xc] %v239_v23  ;;  %v210_v25 = vsel %vm209_vm1, %v202_v20, %v208_v24  ;;  %v231_v26 = vpop.permute.xlu0 %230  ;;  %v219_v27 = vpop.permute.xlu1 %218 }
  0x8e   : > { %214 = vst [vmem:[#allocation2] sm:$0xcc] %v210_v25  ;;  %v234_v29 = vrot.slane %v231_v26, 4  ;;  %v221_v30 = vrot.slane %v219_v27, 4 }
  0x90   : > { %v236_v31 = vsel %vm207_vm3, %v234_v29, %v235_v21  ;;  %v222_v32 = vsel %vm207_vm3, %v220_v28, %v221_v30  ;;  %v225_v33 = vsel %vm223_vm4, %v219_v27, %v221_v30 }
  0x91   : > { %v238_v34 = vsel %vm237_vm2, %v231_v26, %v236_v31  ;;  %v224_v35 = vsel %vm223_vm4, %v217_v15, %v222_v32  ;;  %229 = vst [vmem:[#allocation2 + $0x14] sm:$0x3] %v225_v33  ;;  %v245_v36 = vpop.permute.xlu0 %244  ;;  %v247_v37 = vpop.permute.xlu1 %246 }
  0x92   : > { %242 = vst [vmem:[#allocation2 + $0xc] sm:$0xcc] %v238_v34  ;;  %228 = vst [vmem:[#allocation2 + $0xc] sm:$0x33] %v224_v35  ;;  %v248_v38 = vrot.slane %v245_v36, 4  ;;  %v249_v39 = vrot.slane %v247_v37, 4 }
  0x94   : > { %v250_v40 = vsel %vm207_vm3, %v248_v38, %v249_v39  ;;  %v253_v41 = vsel %vm251_vm5, %v247_v37, %v249_v39 }
  0x95   : > { %v252_v42 = vsel %vm251_vm5, %v245_v36, %v250_v40  ;;  %257 = vst [vmem:[#allocation2 + $0x20] sm:$0x3] %v253_v41  ;;  %v259_v43 = vpop.permute.xlu0 %258  ;;  %v261_v44 = vpop.permute.xlu1 %260 }
  0x96   : > { %256 = vst [vmem:[#allocation2 + $0x18] sm:$0x33] %v252_v42  ;;  %v262_v45 = vrot.slane %v259_v43, 4  ;;  %v263_v46 = vrot.slane %v261_v44, 4 }
  0x98   : > { %v264_v47 = vsel %vm207_vm3, %v262_v45, %v263_v46  ;;  %v267_v48 = vsel %vm265_vm6, %v261_v44, %v263_v46  ;;  %v588_v49 = vld [vmem:[#allocation2 + $0x8] ss:$12 sps:$4 sm:$0xff]  }
  0x99   : > { %v266_v50 = vsel %vm265_vm6, %v259_v43, %v264_v47  ;;  %271 = vst [vmem:[#allocation2 + $0x20] sm:$0xc] %v267_v48  ;;  %v273_v51 = vpop.permute.xlu0 %272  ;;  %v275_v52 = vpop.permute.xlu1 %274  ;;  %v589_v53 = vld [vmem:[#allocation2 + $0x4] ss:$12 sps:$4 sm:$0xff]   ;;  %v591_v54 = vld [vmem:[#allocation2] ss:$12 sps:$4 sm:$0xff]   ;;  %557 = vmatpush3.bf16.msra.mxu1 %v588_v49 }
  0x9a   : > { %270 = vst [vmem:[#allocation2 + $0x18] sm:$0xcc] %v266_v50  ;;  %v276_v55 = vrot.slane %v273_v51, 4  ;;  %v277_v56 = vrot.slane %v275_v52, 4  ;;  %385 = vmatprep.subr.bf16.mxu0 %v589_v53  ;;  %558 = vmatprep.subr.bf16.mxu1 %v611_v12 }
  0x9b   : > { %386 = vmatpush1.bf16.msra.mxu0 %v591_v54 }
  0x9c   : > { %v278_v57 = vsel %vm207_vm3, %v276_v55, %v277_v56  ;;  %v281_v58 = vsel %vm279_vm7, %v275_v52, %v277_v56 }
  0x9d   : > { %v280_v59 = vsel %vm279_vm7, %v273_v51, %v278_v57  ;;  %285 = vst [vmem:[#allocation2 + $0x2c] sm:$0x3] %v281_v58  ;;  %v287_v60 = vpop.permute.xlu0 %286  ;;  %v289_v61 = vpop.permute.xlu1 %288 }
  0x9e   : > { %284 = vst [vmem:[#allocation2 + $0x24] sm:$0x33] %v280_v59  ;;  %v290_v62 = vrot.slane %v287_v60, 4  ;;  %v291_v63 = vrot.slane %v289_v61, 4 }
  0xa0   : > { %v292_v0 = vsel %vm207_vm3, %v290_v62, %v291_v63  ;;  %v295_v1 = vsel %vm293_vm8, %v289_v61, %v291_v63 }
  0xa1   : > { %v294_v2 = vsel %vm293_vm8, %v287_v60, %v292_v0  ;;  %299 = vst [vmem:[#allocation2 + $0x2c] sm:$0xc] %v295_v1  ;;  %v301_v3 = vpop.permute.xlu0 %300  ;;  %v303_v4 = vpop.permute.xlu1 %302 }
  0xa2   : > { %298 = vst [vmem:[#allocation2 + $0x24] sm:$0xcc] %v294_v2  ;;  %v304_v5 = vrot.slane %v301_v3, 4  ;;  %v305_v6 = vrot.slane %v303_v4, 4 }
  0xa4   : > { %v306_v7 = vsel %vm207_vm3, %v304_v5, %v305_v6  ;;  %v309_v8 = vsel %vm307_vm9, %v303_v4, %v305_v6 }
  0xa5   : > { %v308_v9 = vsel %vm307_vm9, %v301_v3, %v306_v7  ;;  %313 = vst [vmem:[#allocation2 + $0x38] sm:$0x3] %v309_v8 }
  0xa6   : > { %312 = vst [vmem:[#allocation2 + $0x30] sm:$0x33] %v308_v9 }
  0xa8   : > { %v592_v10 = vld [vmem:[#allocation2 + $0x20] ss:$12 sps:$4 sm:$0xff]  }
  0xa9   : > { %v593_v11 = vld [vmem:[#allocation2 + $0x1c] ss:$12 sps:$4 sm:$0xff]   ;;  %v595_v13 = vld [vmem:[#allocation2 + $0x18] ss:$12 sps:$4 sm:$0xff]   ;;  %559 = vmatpush3.bf16.msra.mxu1 %v592_v10 }
  0xaa   : > { %387 = vmatprep.subr.bf16.mxu0 %v593_v11  ;;  %560 = vmatprep.subr.bf16.mxu1 %v611_v12 }
  0xab   : > { %388 = vmatpush1.bf16.msra.mxu0 %v595_v13 }
  0xac   : > { %v597_v14 = vld [vmem:[#allocation2 + $0x38] ss:$0 sps:$4 sm:$0x33]  }
  0xad   : > { %v323_v15 = vld [vmem:[#allocation2 + $0x30] sm:$0x33]  ;;  %v383_v17 = vsel %vm375_vm10, %v597_v14, 0 }
  0xae   : > { %v544_v16 = vcombine.high %v323_v15, %v323_v15  ;;  %v543_v18 = vcombine.low %v323_v15, %v323_v15  ;;  %561 = vmatpush3.bf16.msra.mxu1 %v383_v17 }
  0xb0   : > { %546 = vmatprep.subr.msk.bf16.mxu0 %vm375_vm10, %v544_v16  ;;  %v377_v20 = vsel %vm375_vm10, %v543_v18, 0 }
  0xb1   : > { %390 = vmatpush1.bf16.msra.mxu0 %v377_v20  ;;  %563 = vmatmul.mubr.msk.bf16.vlgmr.msra.gmra.mrb[0].mxu1 %vm371_vm11, %v314_v19 }
  0xb2   : > { %v329_v12 = vpop.permute.xlu0 %328 }
  0xb4   : > { %547 = vmatmul.mubr.msk.bf16.vlgmr.msra.gmra.mrb[0].mxu0 %vm371_vm11, %v314_v19 }
 0x184   : > { %v460_v21 = vpop.f32.mrb[0].mxu1 }
 0x185   : > { %v461_v22 = vadd.f32 %v460_v21, %v329_v12  ;;  %v564_v23 = vpop.f32.mrb[1].mxu1 }
 0x186   : > { %v463_v25 = vpop.f32.mrb[2].mxu1 }
 0x187   : > { %v419_v24 = vpop.f32.mrb[0].mxu0  ;;  %v468_v26 = vmax.f32 %v461_v22, 0.0  ;;  %v565_v29 = vpop.f32.mrb[3].mxu1 }
 0x188   : > { %v420_v27 = vadd.f32 %v419_v24, %v329_v12  ;;  %v421_v28 = vpop.f32.mrb[1].mxu0 }
 0x189   : > { %v422_v30 = vadd.f32 %v421_v28, %v329_v12  ;;  %v423_v31 = vpop.f32.mrb[2].mxu0  ;;  %471 = vst [vmem:[%s170_s6 + $0x10] sm:$0xff] %v468_v26 }
 0x18a   : > { %v466_v32 = vmax.f32 %v420_v27, 0.0  ;;  %v424_v33 = vpop.f32.mrb[3].mxu0 }
 0x18b   : > { %v467_v34 = vmax.f32 %v422_v30, 0.0 }
 0x18c   : > { %469 = vst [vmem:[%s170_s6] sm:$0xff] %v466_v32 }
 0x18d   : > { %470 = vst [vmem:[%s170_s6 + $0x8] sm:$0xff] %v467_v34 }
 0x18e PF: > { %s13_s12 = sadd.s32 1, %s605_s12  }
 0x18f   : > { %p10_p4 = scmp.ge.s32.totalorder %s13_s12, 4  }
 0x191   :  { %12 = sbr.rel (!%p10_p4) target bundleno = 1 (0x1), region = 62 }

</bundles_post_ra>
